<compile_context>
chip_gen: v5e
topology: v5e:2x2
jax: 0.10.0
libtpu: 0.0.40
codegen_flags: <defaults>
</compile_context>

<pallas_src>
import jax
import jax.numpy as jnp
from jax.experimental import pallas as pl
from jax.experimental.pallas import tpu as pltpu


def _round_up(x, m):
    return ((x + m - 1) // m) * m


def _sublane(dtype):
    itemsize = jnp.dtype(dtype).itemsize
    if itemsize >= 4:
        return 8
    if itemsize == 2:
        return 16
    return 32


def _vmem_limit_bytes():
    """~3/4 of physical VMEM: ~96 MiB on v5e/v6e, ~48 MiB on v7x."""
    try:
        cap = int(pltpu.get_tpu_info().vmem_capacity_bytes)
    except Exception:
        cap = 64 * 1024 * 1024  # conservative fallback (v7x per-TC physical)
    return (cap * 3) // 4


_HEADROOM_BYTES = 4 * 1024 * 1024
_TM_CAP = 4096


# -----------------------------------------------------------------------------
# Kernels  (weight arrives already transposed: wt_ref is [K, O] tiles)
# -----------------------------------------------------------------------------
def _linear_resident_kernel(x_ref, wt_ref, o_ref):
    """Whole [K, O] weight resident in VMEM; one (tm, O) output tile per step."""
    o_ref[...] = jnp.dot(
        x_ref[...], wt_ref[...], preferred_element_type=jnp.float32
    ).astype(o_ref.dtype)


def _linear_tiled_kernel_f32(x_ref, wt_ref, o_ref):
    """Tiled matmul; f32 output accumulated in place (k is the last grid axis)."""
    @pl.when(pl.program_id(2) == 0)
    def _():
        o_ref[...] = jnp.zeros_like(o_ref)

    o_ref[...] += jnp.dot(
        x_ref[...], wt_ref[...], preferred_element_type=jnp.float32
    )


def _linear_tiled_kernel_acc(x_ref, wt_ref, o_ref, acc_ref):
    """Tiled matmul with f32 scratch accumulator (narrow output dtypes)."""
    @pl.when(pl.program_id(2) == 0)
    def _():
        acc_ref[...] = jnp.zeros_like(acc_ref)

    acc_ref[...] += jnp.dot(
        x_ref[...], wt_ref[...], preferred_element_type=jnp.float32
    )

    @pl.when(pl.program_id(2) == pl.num_programs(2) - 1)
    def _():
        o_ref[...] = acc_ref[...].astype(o_ref.dtype)


# -----------------------------------------------------------------------------
# Wrapper
# -----------------------------------------------------------------------------
def mlp_update(x, weight, *, _force_tiled=False):
    """y = x @ weight.T  (PyTorch nn.Linear with bias=False semantics).

    x:      [N, in_channels]
    weight: [out_channels, in_channels]   (native PyTorch layout)
    returns [N, out_channels] in x.dtype
    """
    N, K = x.shape
    O, K2 = weight.shape
    assert K == K2, "in_channels mismatch"
    out_dtype = x.dtype
    sub = _sublane(out_dtype)
    x_item = jnp.dtype(x.dtype).itemsize
    w_item = jnp.dtype(weight.dtype).itemsize
    o_item = jnp.dtype(out_dtype).itemsize

    vmem_limit = _vmem_limit_bytes()
    resident_w_max = vmem_limit // 4           # ~24 MiB v5e/v6e, ~12 MiB v7x

    # One small HBM pass over the weight; kernels then need no RHS transpose.
    w_t = jnp.transpose(weight)                # [K, O]
    w_bytes = O * K * w_item

    cost = pl.CostEstimate(
        flops=2 * N * K * O,
        transcendentals=0,
        bytes_accessed=N * K * x_item + K * O * w_item + N * O * o_item,
    )

    # ------------------------------------------------------------------
    # Resident-weight fast path: constant weight block index (DMA'd once,
    # single-buffered), no K reduction axis, no padding at all.
    # ------------------------------------------------------------------
    if (w_bytes <= resident_w_max) and not _force_tiled:
        per_row = 2 * K * x_item + 2 * O * o_item      # dbl-buffered x + out rows
        budget = vmem_limit - 2 * w_bytes - _HEADROOM_BYTES
        tm = budget // per_row if per_row > 0 else _TM_CAP
        tm = min(tm, _TM_CAP, _round_up(N, sub))
        if N >= 1024:
            # >= 2 grid steps so v7x's two TensorCores both get work.
            tm = min(tm, _round_up(pl.cdiv(N, 2), sub))
        tm = (tm // sub) * sub
        if tm >= sub:
            grid_m = pl.cdiv(N, tm)      # ragged last block masked by Pallas
            return pl.pallas_call(
                _linear_resident_kernel,
                out_shape=jax.ShapeDtypeStruct((N, O), out_dtype),
                grid_spec=pltpu.PrefetchScalarGridSpec(
                    num_scalar_prefetch=0,
                    grid=(grid_m,),
                    in_specs=[
                        pl.BlockSpec((tm, K), lambda i: (i, 0)),
                        pl.BlockSpec((K, O), lambda i: (0, 0),
                                     pipeline_mode=pl.Buffered(1)),
                    ],
                    out_specs=pl.BlockSpec((tm, O), lambda i: (i, 0)),
                ),
                compiler_params=pltpu.CompilerParams(
                    dimension_semantics=("parallel",),
                    vmem_limit_bytes=vmem_limit,
                ),
                cost_estimate=cost,
            )(x, w_t)
        # else: x/out rows for even the minimum tile won't fit next to the
        # weight -> fall through to the tiled path.

    # ------------------------------------------------------------------
    # General tiled path: 3-D grid, reduction axis last.  Activations are not
    # padded along M (cdiv grid + masked partial blocks); K is zero-padded
    # only when it must be tiled; the small weight is padded for ragged O.
    # ------------------------------------------------------------------
    tm = min(512, _round_up(N, sub))
    tn = min(512, _round_up(O, 128))
    tk_default = 1024 if x_item >= 4 else 2048

    if K <= tk_default:
        tk, Kp = K, K                      # full contraction dim per block
        x_p, w_p = x, w_t
    else:
        tk = tk_default
        Kp = _round_up(K, tk)
        x_p = jnp.pad(x, ((0, 0), (0, Kp - K))) if Kp != K else x
        w_p = jnp.pad(w_t, ((0, Kp - K), (0, 0))) if Kp != K else w_t

    Op = _round_up(O, tn)
    if Op != O:
        w_p = jnp.pad(w_p, ((0, 0), (0, Op - O)))

    if jnp.dtype(out_dtype) == jnp.float32:
        kernel, scratch = _linear_tiled_kernel_f32, []
    else:
        kernel, scratch = _linear_tiled_kernel_acc, [pltpu.VMEM((tm, tn), jnp.float32)]

    out = pl.pallas_call(
        kernel,
        out_shape=jax.ShapeDtypeStruct((N, Op), out_dtype),
        grid_spec=pltpu.PrefetchScalarGridSpec(
            num_scalar_prefetch=0,
            grid=(pl.cdiv(N, tm), Op // tn, Kp // tk),
            in_specs=[
                pl.BlockSpec((tm, tk), lambda i, j, k: (i, k)),
                pl.BlockSpec((tk, tn), lambda i, j, k: (k, j)),   # [K, O] layout
            ],
            out_specs=pl.BlockSpec((tm, tn), lambda i, j, k: (i, j)),
            scratch_shapes=scratch,
        ),
        compiler_params=pltpu.CompilerParams(
            dimension_semantics=("parallel", "parallel", "arbitrary"),
            vmem_limit_bytes=vmem_limit,
        ),
        cost_estimate=cost,
    )(x_p, w_p)
    return out if Op == O else out[:, :O]


if __name__ == "__main__":
    # Flickr-style node-feature matrix through a bias-free Linear, small shapes.
    N, in_channels, out_channels = 256, 128, 256

    key = jax.random.PRNGKey(0)
    kx, kw = jax.random.split(key)

    x = jax.random.normal(kx, (N, in_channels), dtype=jnp.float32)
    # nn.Linear default init (PyTorch layout [out, in]), uniform +/- 1/sqrt(in).
    bound = 1.0 / jnp.sqrt(jnp.float32(in_channels))
    weight = jax.random.uniform(
        kw, (out_channels, in_channels), dtype=jnp.float32,
        minval=-bound, maxval=bound,
    )

    # 1) Fast path: whole weight resident (single-buffered) in VMEM.
    y = mlp_update(x, weight)
    jax.block_until_ready(y)
    y_ref = x @ weight.T
    assert y.shape == (N, out_channels)
    assert jnp.allclose(y, y_ref, atol=1e-4, rtol=1e-4)

    # 2) Tiled path (forced) with ragged N/K/O: exercises cdiv grid, masked
    #    partial M block, weight-only O padding, in-place f32 accumulation.
    N2, K2, O2 = 300, 200, 130
    kx2, kw2 = jax.random.split(jax.random.PRNGKey(1))
    x2 = jax.random.normal(kx2, (N2, K2), dtype=jnp.float32)
    w2 = jax.random.normal(kw2, (O2, K2), dtype=jnp.float32) * 0.05
    y2 = mlp_update(x2, w2, _force_tiled=True)
    jax.block_until_ready(y2)
    assert y2.shape == (N2, O2)
    assert jnp.allclose(y2, x2 @ w2.T, atol=1e-3, rtol=1e-3)

    # 3) bf16 in/out (forced tiled): exercises the f32 scratch accumulator and
    #    the 16-row sublane rounding for narrow dtypes.
    xb = x.astype(jnp.bfloat16)
    wb = weight.astype(jnp.bfloat16)
    y3 = mlp_update(xb, wb, _force_tiled=True)
    jax.block_until_ready(y3)
    y3_ref = xb.astype(jnp.float32) @ wb.astype(jnp.float32).T
    assert y3.shape == (N, out_channels)
    assert jnp.allclose(y3.astype(jnp.float32), y3_ref, atol=2e-2, rtol=2e-2)

    print("KERNEL_OK")
</pallas_src>

<mosaic_0001>
module attributes {stable_mosaic.version = 11 : i64} {
  func.func @_linear_resident_kernel(%arg0: i32, %arg1: memref<256x128xf32, #tpu.memory_space<vmem>>, %arg2: memref<128x256xf32, #tpu.memory_space<vmem>>, %arg3: memref<256x256xf32, #tpu.memory_space<vmem>>) attributes {dimension_semantics = [#tpu.dimension_semantics<parallel>], iteration_bounds = array<i64: 1>, scalar_prefetch = 0 : i64, scratch_operands = 0 : i64, tpu.core_type = #tpu.core_type<tc>, window_params = [{transform_indices = @transform_0, window_bounds = array<i64: 256, 128>}, {pipeline_mode = #tpu.pipeline_mode<synchronous>, transform_indices = @transform_1, window_bounds = array<i64: 128, 256>}, {transform_indices = @transform_2, window_bounds = array<i64: 256, 256>}]} {
    %c0 = arith.constant 0 : index
    %c0_0 = arith.constant 0 : index
    %0 = vector.load %arg1[%c0, %c0_0] : memref<256x128xf32, #tpu.memory_space<vmem>>, vector<256x128xf32>
    %c0_1 = arith.constant 0 : index
    %c0_2 = arith.constant 0 : index
    %1 = vector.load %arg2[%c0_1, %c0_2] : memref<128x256xf32, #tpu.memory_space<vmem>>, vector<128x256xf32>
    %cst = arith.constant dense<0.000000e+00> : vector<256x256xf32>
    %2 = tpu.matmul %0, %1, %cst {dimension_numbers = #tpu.dot_dimension_numbers<[1], [0], [0], [1], [0, 0, 1, 1], [], []>} : vector<256x128xf32>, vector<128x256xf32>, vector<256x256xf32> -> vector<256x256xf32>
    %c0_3 = arith.constant 0 : index
    %c0_4 = arith.constant 0 : index
    %3 = vector.load %arg3[%c0_3, %c0_4] : memref<256x256xf32, #tpu.memory_space<vmem>>, vector<256x256xf32>
    tpu.vector_store %arg3[%c0_3, %c0_4], %2 {strides = array<i32>} : memref<256x256xf32, #tpu.memory_space<vmem>>, vector<256x256xf32>,
    return
  }
  func.func @transform_0(%arg0: i32) -> (i32, i32) {
    %c0_i32 = arith.constant 0 : i32
    %c0_i32_0 = arith.constant 0 : i32
    return %arg0, %c0_i32 : i32, i32
  }
  func.func @transform_1(%arg0: i32) -> (i32, i32) {
    %c0_i32 = arith.constant 0 : i32
    %c0_i32_0 = arith.constant 0 : i32
    %c0_i32_1 = arith.constant 0 : i32
    return %c0_i32, %c0_i32_0 : i32, i32
  }
  func.func @transform_2(%arg0: i32) -> (i32, i32) {
    %c0_i32 = arith.constant 0 : i32
    %c0_i32_0 = arith.constant 0 : i32
    return %arg0, %c0_i32 : i32, i32
  }
}

</mosaic_0001>

<bundles_post_ra>
// kernel: tpu_custom_call.1
= control target key start
LH: loop header
LB: loop body
LE: loop exit
PB: predicated region body
PF: predicated region fallthrough
CT: control target
= control target key end

     0   :  { %7 = vsyncpa [#allocation3], 0  ;;  %s572_s0 = inlined_call_operand.hbm [shape: f32[256,128], index: 0, kind: input, shape index: {}]   ;;  %s573_s1 = inlined_call_operand.hbm [shape: f32[128,256], index: 1, kind: input, shape index: {}]   ;;  %s574_s2 = inlined_call_operand.hbm [shape: f32[256,256], index: 2, kind: output, shape index: {}]  }
   0x1   :  { %8 = vsyncpa [#allocation6], 0 }
   0x2   :  { %9 = vsyncpa [#allocation4], 0  ;;  %s14_s11 = sshll.u32 %s572_s0, 4  ;;  %s535_s12 = smov [#allocation2]   ;;  %s15_s11 = int_to_ptr.hbm [resolvable:$true] %s14_s11 }
   0x3   :  { %s16_s13 = sshll.u32 %s535_s12, 4  ;;  %s27_s16 = sshll.u32 %s573_s1, 4  ;;  %s17_s13 = int_to_ptr.vmem [resolvable:$true] %s16_s13  ;;  %s28_s16 = int_to_ptr.hbm [resolvable:$true] %s27_s16 }
   0x4   :  { %s536_s17 = smov 128   ;;  %s537_s18 = smov 8  }
   0x5   :  { %22 = dma.hbm_to_vmem [thread:$0]  %s15_s11, 4096, %s17_s13, [#allocation3], %s536_s17, %s536_s17, %s537_s18  }
   0x6   :  { %s538_s19 = smov [#allocation5]   ;;  %s539_s21 = smov 256  }
   0x7   :  { %s29_s20 = sshll.u32 %s538_s19, 4  ;;  %s540_s22 = smov 16   ;;  %s30_s20 = int_to_ptr.vmem [resolvable:$true] %s29_s20 }
   0x8   :  { %35 = dma.hbm_to_vmem [thread:$0]  %s28_s16, 4096, %s30_s20, [#allocation6], %s539_s21, %s539_s21, %s540_s22  }
   0x9   :  { %529 = dma.done.wait [#allocation3], 4096  }
   0xa   :  { %530 = vsyncadd [#allocation3], 4294963200 }
   0xb   :  { %531 = dma.done.wait [#allocation6], 4096  }
   0xc   :  { %532 = vsyncadd [#allocation6], 4294963200  ;;  %v106_v0 = vld [vmem:[#allocation5 + $0xf0] sm:$0xff]  ;;  %v107_v1 = vld [vmem:[#allocation5 + $0xf8] sm:$0xff]  ;;  %s541_s0 = smov [#allocation7]   ;;  %s404_s25 = sshll.u32 %s574_s2, 4  ;;  %s405_s25 = int_to_ptr.hbm [resolvable:$true] %s404_s25 }
   0xd   :  { %v104_v2 = vld [vmem:[#allocation5 + $0xe0] sm:$0xff]  ;;  %418 = vmatpush.msra.mxu2 %v106_v0  ;;  %434 = vmatpush.msra.mxu3 %v107_v1  ;;  %v105_v3 = vld [vmem:[#allocation5 + $0xe8] sm:$0xff]  ;;  %v102_v4 = vld [vmem:[#allocation5 + $0xd0] sm:$0xff]  ;;  %s402_s1 = sshll.u32 %s541_s0, 4  ;;  %s403_s1 = int_to_ptr.vmem [resolvable:$true] %s402_s1 }
   0xe   :  { %v103_v5 = vld [vmem:[#allocation5 + $0xd8] sm:$0xff]  ;;  %108 = vmatpush.msra.mxu0 %v106_v0  ;;  %221 = vmatpush.msra.mxu1 %v107_v1  ;;  %v100_v6 = vld [vmem:[#allocation5 + $0xc0] sm:$0xff]  ;;  %v101_v7 = vld [vmem:[#allocation5 + $0xc8] sm:$0xff] }
   0xf   :  { %419 = vmatpush.msra.mxu2 %v104_v2  ;;  %435 = vmatpush.msra.mxu3 %v105_v3  ;;  %v98_v8 = vld [vmem:[#allocation5 + $0xb0] sm:$0xff]  ;;  %v99_v9 = vld [vmem:[#allocation5 + $0xb8] sm:$0xff]  ;;  %v96_v10 = vld [vmem:[#allocation5 + $0xa0] sm:$0xff] }
  0x10   :  { %109 = vmatpush.msra.mxu0 %v104_v2  ;;  %222 = vmatpush.msra.mxu1 %v105_v3  ;;  %v97_v11 = vld [vmem:[#allocation5 + $0xa8] sm:$0xff]  ;;  %v94_v12 = vld [vmem:[#allocation5 + $0x90] sm:$0xff]  ;;  %v95_v13 = vld [vmem:[#allocation5 + $0x98] sm:$0xff] }
  0x11   :  { %420 = vmatpush.msra.mxu2 %v102_v4  ;;  %436 = vmatpush.msra.mxu3 %v103_v5  ;;  %v92_v14 = vld [vmem:[#allocation5 + $0x80] sm:$0xff]  ;;  %v93_v15 = vld [vmem:[#allocation5 + $0x88] sm:$0xff]  ;;  %v90_v16 = vld [vmem:[#allocation5 + $0x70] sm:$0xff] }
  0x12   :  { %110 = vmatpush.msra.mxu0 %v102_v4  ;;  %223 = vmatpush.msra.mxu1 %v103_v5  ;;  %v91_v17 = vld [vmem:[#allocation5 + $0x78] sm:$0xff]  ;;  %v88_v18 = vld [vmem:[#allocation5 + $0x60] sm:$0xff]  ;;  %v89_v19 = vld [vmem:[#allocation5 + $0x68] sm:$0xff] }
  0x13   :  { %421 = vmatpush.msra.mxu2 %v100_v6  ;;  %437 = vmatpush.msra.mxu3 %v101_v7  ;;  %v86_v20 = vld [vmem:[#allocation5 + $0x50] sm:$0xff]  ;;  %v87_v21 = vld [vmem:[#allocation5 + $0x58] sm:$0xff]  ;;  %v84_v22 = vld [vmem:[#allocation5 + $0x40] sm:$0xff] }
  0x14   :  { %111 = vmatpush.msra.mxu0 %v100_v6  ;;  %224 = vmatpush.msra.mxu1 %v101_v7  ;;  %v85_v23 = vld [vmem:[#allocation5 + $0x48] sm:$0xff]  ;;  %v82_v24 = vld [vmem:[#allocation5 + $0x30] sm:$0xff]  ;;  %v83_v25 = vld [vmem:[#allocation5 + $0x38] sm:$0xff] }
  0x15   :  { %422 = vmatpush.msra.mxu2 %v98_v8  ;;  %438 = vmatpush.msra.mxu3 %v99_v9  ;;  %v80_v26 = vld [vmem:[#allocation5 + $0x20] sm:$0xff]  ;;  %v81_v27 = vld [vmem:[#allocation5 + $0x28] sm:$0xff]  ;;  %v78_v28 = vld [vmem:[#allocation5 + $0x10] sm:$0xff] }
  0x16   :  { %112 = vmatpush.msra.mxu0 %v98_v8  ;;  %225 = vmatpush.msra.mxu1 %v99_v9  ;;  %v79_v29 = vld [vmem:[#allocation5 + $0x18] sm:$0xff]  ;;  %v76_v30 = vld [vmem:[#allocation5] sm:$0xff]  ;;  %v77_v31 = vld [vmem:[#allocation5 + $0x8] sm:$0xff] }
  0x17   :  { %423 = vmatpush.msra.mxu2 %v96_v10  ;;  %439 = vmatpush.msra.mxu3 %v97_v11  ;;  %v60_v32 = vld [vmem:[#allocation2 + $0x80] sm:$0xff]  ;;  %v61_v34 = vld [vmem:[#allocation2 + $0x88] sm:$0xff]  ;;  %v62_v36 = vld [vmem:[#allocation2 + $0x90] sm:$0xff] }
  0x18   :  { %113 = vmatpush.msra.mxu0 %v96_v10  ;;  %226 = vmatpush.msra.mxu1 %v97_v11  ;;  %v44_v33 = vld [vmem:[#allocation2] sm:$0xff]  ;;  %v45_v35 = vld [vmem:[#allocation2 + $0x8] sm:$0xff]  ;;  %v46_v37 = vld [vmem:[#allocation2 + $0x10] sm:$0xff] }
  0x19   :  { %424 = vmatpush.msra.mxu2 %v94_v12  ;;  %440 = vmatpush.msra.mxu3 %v95_v13  ;;  %v63_v38 = vld [vmem:[#allocation2 + $0x98] sm:$0xff]  ;;  %v64_v40 = vld [vmem:[#allocation2 + $0xa0] sm:$0xff]  ;;  %v65_v42 = vld [vmem:[#allocation2 + $0xa8] sm:$0xff] }
  0x1a   :  { %114 = vmatpush.msra.mxu0 %v94_v12  ;;  %227 = vmatpush.msra.mxu1 %v95_v13  ;;  %v47_v39 = vld [vmem:[#allocation2 + $0x18] sm:$0xff]  ;;  %v48_v41 = vld [vmem:[#allocation2 + $0x20] sm:$0xff]  ;;  %v49_v43 = vld [vmem:[#allocation2 + $0x28] sm:$0xff] }
  0x1b   :  { %425 = vmatpush.msra.mxu2 %v92_v14  ;;  %441 = vmatpush.msra.mxu3 %v93_v15  ;;  %v66_v44 = vld [vmem:[#allocation2 + $0xb0] sm:$0xff]  ;;  %v67_v46 = vld [vmem:[#allocation2 + $0xb8] sm:$0xff]  ;;  %v68_v48 = vld [vmem:[#allocation2 + $0xc0] sm:$0xff] }
  0x1c   :  { %115 = vmatpush.msra.mxu0 %v92_v14  ;;  %228 = vmatpush.msra.mxu1 %v93_v15  ;;  %v50_v45 = vld [vmem:[#allocation2 + $0x30] sm:$0xff]  ;;  %v51_v47 = vld [vmem:[#allocation2 + $0x38] sm:$0xff]  ;;  %v52_v49 = vld [vmem:[#allocation2 + $0x40] sm:$0xff] }
  0x1d   :  { %426 = vmatpush.msra.mxu2 %v90_v16  ;;  %442 = vmatpush.msra.mxu3 %v91_v17  ;;  %v69_v50 = vld [vmem:[#allocation2 + $0xc8] sm:$0xff]  ;;  %v70_v52 = vld [vmem:[#allocation2 + $0xd0] sm:$0xff]  ;;  %v71_v54 = vld [vmem:[#allocation2 + $0xd8] sm:$0xff] }
  0x1e   :  { %116 = vmatpush.msra.mxu0 %v90_v16  ;;  %229 = vmatpush.msra.mxu1 %v91_v17  ;;  %v53_v51 = vld [vmem:[#allocation2 + $0x48] sm:$0xff]  ;;  %v54_v53 = vld [vmem:[#allocation2 + $0x50] sm:$0xff]  ;;  %v55_v55 = vld [vmem:[#allocation2 + $0x58] sm:$0xff] }
  0x1f   :  { %427 = vmatpush.msra.mxu2 %v88_v18  ;;  %443 = vmatpush.msra.mxu3 %v89_v19  ;;  %v72_v56 = vld [vmem:[#allocation2 + $0xe0] sm:$0xff]  ;;  %v73_v58 = vld [vmem:[#allocation2 + $0xe8] sm:$0xff]  ;;  %v74_v60 = vld [vmem:[#allocation2 + $0xf0] sm:$0xff] }
  0x20   :  { %117 = vmatpush.msra.mxu0 %v88_v18  ;;  %230 = vmatpush.msra.mxu1 %v89_v19  ;;  %v56_v57 = vld [vmem:[#allocation2 + $0x60] sm:$0xff]  ;;  %v57_v59 = vld [vmem:[#allocation2 + $0x68] sm:$0xff]  ;;  %v58_v61 = vld [vmem:[#allocation2 + $0x70] sm:$0xff] }
  0x21   :  { %428 = vmatpush.msra.mxu2 %v86_v20  ;;  %444 = vmatpush.msra.mxu3 %v87_v21  ;;  %v75_v62 = vld [vmem:[#allocation2 + $0xf8] sm:$0xff] }
  0x22   :  { %118 = vmatpush.msra.mxu0 %v86_v20  ;;  %231 = vmatpush.msra.mxu1 %v87_v21  ;;  %v59_v63 = vld [vmem:[#allocation2 + $0x78] sm:$0xff] }
  0x23   :  { %429 = vmatpush.msra.mxu2 %v84_v22  ;;  %445 = vmatpush.msra.mxu3 %v85_v23 }
  0x24   :  { %119 = vmatpush.msra.mxu0 %v84_v22  ;;  %232 = vmatpush.msra.mxu1 %v85_v23 }
  0x25   :  { %430 = vmatpush.msra.mxu2 %v82_v24  ;;  %446 = vmatpush.msra.mxu3 %v83_v25 }
  0x26   :  { %120 = vmatpush.msra.mxu0 %v82_v24  ;;  %233 = vmatpush.msra.mxu1 %v83_v25 }
  0x27   :  { %431 = vmatpush.msra.mxu2 %v80_v26  ;;  %447 = vmatpush.msra.mxu3 %v81_v27 }
  0x28   :  { %121 = vmatpush.msra.mxu0 %v80_v26  ;;  %234 = vmatpush.msra.mxu1 %v81_v27 }
  0x29   :  { %432 = vmatpush.msra.mxu2 %v78_v28  ;;  %448 = vmatpush.msra.mxu3 %v79_v29 }
  0x2a   :  { %122 = vmatpush.msra.mxu0 %v78_v28  ;;  %235 = vmatpush.msra.mxu1 %v79_v29 }
  0x2b   :  { %433 = vmatpush.msra.mxu2 %v76_v30  ;;  %449 = vmatpush.msra.mxu3 %v77_v31 }
  0x2c   :  { %172 = vmatmul.f32.vlgmr.msra.gmra.mxu2 %v60_v32  ;;  %285 = vmatmul.f32.vlgmr.msra.gmra.mxu3 %v60_v32 }
  0x2d   :  { %123 = vmatpush.msra.mxu0 %v76_v30  ;;  %236 = vmatpush.msra.mxu1 %v77_v31 }
  0x2e   :  { %124 = vmatmul.f32.vlgmr.msra.gmra.mxu0 %v44_v33  ;;  %237 = vmatmul.f32.vlgmr.msra.gmra.mxu1 %v44_v33 }
  0x34   :  { %175 = vmatmul.f32.gmra.mxu2 %v61_v34  ;;  %288 = vmatmul.f32.gmra.mxu3 %v61_v34 }
  0x36   :  { %127 = vmatmul.f32.gmra.mxu0 %v45_v35  ;;  %240 = vmatmul.f32.gmra.mxu1 %v45_v35 }
  0x3c   :  { %178 = vmatmul.f32.gmra.mxu2 %v62_v36  ;;  %291 = vmatmul.f32.gmra.mxu3 %v62_v36 }
  0x3e   :  { %130 = vmatmul.f32.gmra.mxu0 %v46_v37  ;;  %243 = vmatmul.f32.gmra.mxu1 %v46_v37 }
  0x44   :  { %181 = vmatmul.f32.gmra.mxu2 %v63_v38  ;;  %294 = vmatmul.f32.gmra.mxu3 %v63_v38 }
  0x46   :  { %133 = vmatmul.f32.gmra.mxu0 %v47_v39  ;;  %246 = vmatmul.f32.gmra.mxu1 %v47_v39 }
  0x4c   :  { %184 = vmatmul.f32.gmra.mxu2 %v64_v40  ;;  %297 = vmatmul.f32.gmra.mxu3 %v64_v40 }
  0x4e   :  { %136 = vmatmul.f32.gmra.mxu0 %v48_v41  ;;  %249 = vmatmul.f32.gmra.mxu1 %v48_v41 }
  0x54   :  { %187 = vmatmul.f32.gmra.mxu2 %v65_v42  ;;  %300 = vmatmul.f32.gmra.mxu3 %v65_v42 }
  0x56   :  { %139 = vmatmul.f32.gmra.mxu0 %v49_v43  ;;  %252 = vmatmul.f32.gmra.mxu1 %v49_v43 }
  0x5c   :  { %190 = vmatmul.f32.gmra.mxu2 %v66_v44  ;;  %303 = vmatmul.f32.gmra.mxu3 %v66_v44 }
  0x5e   :  { %142 = vmatmul.f32.gmra.mxu0 %v50_v45  ;;  %255 = vmatmul.f32.gmra.mxu1 %v50_v45 }
  0x64   :  { %193 = vmatmul.f32.gmra.mxu2 %v67_v46  ;;  %306 = vmatmul.f32.gmra.mxu3 %v67_v46 }
  0x66   :  { %145 = vmatmul.f32.gmra.mxu0 %v51_v47  ;;  %258 = vmatmul.f32.gmra.mxu1 %v51_v47 }
  0x6c   :  { %196 = vmatmul.f32.gmra.mxu2 %v68_v48  ;;  %309 = vmatmul.f32.gmra.mxu3 %v68_v48 }
  0x6e   :  { %148 = vmatmul.f32.gmra.mxu0 %v52_v49  ;;  %261 = vmatmul.f32.gmra.mxu1 %v52_v49 }
  0x74   :  { %199 = vmatmul.f32.gmra.mxu2 %v69_v50  ;;  %312 = vmatmul.f32.gmra.mxu3 %v69_v50 }
  0x76   :  { %151 = vmatmul.f32.gmra.mxu0 %v53_v51  ;;  %264 = vmatmul.f32.gmra.mxu1 %v53_v51 }
  0x7c   :  { %202 = vmatmul.f32.gmra.mxu2 %v70_v52  ;;  %315 = vmatmul.f32.gmra.mxu3 %v70_v52 }
  0x7e   :  { %154 = vmatmul.f32.gmra.mxu0 %v54_v53  ;;  %267 = vmatmul.f32.gmra.mxu1 %v54_v53 }
  0x84   :  { %205 = vmatmul.f32.gmra.mxu2 %v71_v54  ;;  %318 = vmatmul.f32.gmra.mxu3 %v71_v54 }
  0x86   :  { %157 = vmatmul.f32.gmra.mxu0 %v55_v55  ;;  %270 = vmatmul.f32.gmra.mxu1 %v55_v55 }
  0x8c   :  { %208 = vmatmul.f32.gmra.mxu2 %v72_v56  ;;  %321 = vmatmul.f32.gmra.mxu3 %v72_v56 }
  0x8e   :  { %160 = vmatmul.f32.gmra.mxu0 %v56_v57  ;;  %273 = vmatmul.f32.gmra.mxu1 %v56_v57 }
  0x94   :  { %211 = vmatmul.f32.gmra.mxu2 %v73_v58  ;;  %324 = vmatmul.f32.gmra.mxu3 %v73_v58 }
  0x96   :  { %163 = vmatmul.f32.gmra.mxu0 %v57_v59  ;;  %276 = vmatmul.f32.gmra.mxu1 %v57_v59 }
  0x9c   :  { %214 = vmatmul.f32.gmra.mxu2 %v74_v60  ;;  %327 = vmatmul.f32.gmra.mxu3 %v74_v60 }
  0x9e   :  { %166 = vmatmul.f32.gmra.mxu0 %v58_v61  ;;  %279 = vmatmul.f32.gmra.mxu1 %v58_v61 }
  0xa4   :  { %217 = vmatmul.f32.gmra.mxu2 %v75_v62  ;;  %330 = vmatmul.f32.gmra.mxu3 %v75_v62 }
  0xa6   :  { %169 = vmatmul.f32.gmra.mxu0 %v59_v63  ;;  %282 = vmatmul.f32.gmra.mxu1 %v59_v63 }
  0xab   :  { %v125_v0 = vpop.f32.mrf.mxu0  ;;  %v238_v1 = vpop.f32.mrf.mxu1 }
  0xac   :  { %334 = vst [vmem:[#allocation7] sm:$0xff] %v125_v0 }
  0xad   :  { %335 = vst [vmem:[#allocation7 + $0x8] sm:$0xff] %v238_v1 }
  0xaf   :  { %v173_v2 = vpop.f32.mrf.mxu2  ;;  %v286_v3 = vpop.f32.mrf.mxu3 }
  0xb0   :  { %366 = vst [vmem:[#allocation7 + $0x100] sm:$0xff] %v173_v2 }
  0xb1   :  { %367 = vst [vmem:[#allocation7 + $0x108] sm:$0xff] %v286_v3 }
  0xb3   :  { %v128_v4 = vpop.f32.mrf.mxu0  ;;  %v241_v5 = vpop.f32.mrf.mxu1 }
  0xb4   :  { %336 = vst [vmem:[#allocation7 + $0x10] sm:$0xff] %v128_v4 }
  0xb5   :  { %337 = vst [vmem:[#allocation7 + $0x18] sm:$0xff] %v241_v5 }
  0xb7   :  { %v176_v6 = vpop.f32.mrf.mxu2  ;;  %v289_v7 = vpop.f32.mrf.mxu3 }
  0xb8   :  { %368 = vst [vmem:[#allocation7 + $0x110] sm:$0xff] %v176_v6 }
  0xb9   :  { %369 = vst [vmem:[#allocation7 + $0x118] sm:$0xff] %v289_v7 }
  0xbb   :  { %v131_v8 = vpop.f32.mrf.mxu0  ;;  %v244_v9 = vpop.f32.mrf.mxu1 }
  0xbc   :  { %338 = vst [vmem:[#allocation7 + $0x20] sm:$0xff] %v131_v8 }
  0xbd   :  { %339 = vst [vmem:[#allocation7 + $0x28] sm:$0xff] %v244_v9 }
  0xbf   :  { %v179_v10 = vpop.f32.mrf.mxu2  ;;  %v292_v11 = vpop.f32.mrf.mxu3 }
  0xc0   :  { %370 = vst [vmem:[#allocation7 + $0x120] sm:$0xff] %v179_v10 }
  0xc1   :  { %371 = vst [vmem:[#allocation7 + $0x128] sm:$0xff] %v292_v11 }
  0xc3   :  { %v134_v12 = vpop.f32.mrf.mxu0  ;;  %v247_v13 = vpop.f32.mrf.mxu1 }
  0xc4   :  { %340 = vst [vmem:[#allocation7 + $0x30] sm:$0xff] %v134_v12 }
  0xc5   :  { %341 = vst [vmem:[#allocation7 + $0x38] sm:$0xff] %v247_v13 }
  0xc7   :  { %v182_v14 = vpop.f32.mrf.mxu2  ;;  %v295_v15 = vpop.f32.mrf.mxu3 }
  0xc8   :  { %372 = vst [vmem:[#allocation7 + $0x130] sm:$0xff] %v182_v14 }
  0xc9   :  { %373 = vst [vmem:[#allocation7 + $0x138] sm:$0xff] %v295_v15 }
  0xcb   :  { %v137_v16 = vpop.f32.mrf.mxu0  ;;  %v250_v17 = vpop.f32.mrf.mxu1 }
  0xcc   :  { %342 = vst [vmem:[#allocation7 + $0x40] sm:$0xff] %v137_v16 }
  0xcd   :  { %343 = vst [vmem:[#allocation7 + $0x48] sm:$0xff] %v250_v17 }
  0xcf   :  { %v185_v18 = vpop.f32.mrf.mxu2  ;;  %v298_v19 = vpop.f32.mrf.mxu3 }
  0xd0   :  { %374 = vst [vmem:[#allocation7 + $0x140] sm:$0xff] %v185_v18 }
  0xd1   :  { %375 = vst [vmem:[#allocation7 + $0x148] sm:$0xff] %v298_v19 }
  0xd3   :  { %v140_v20 = vpop.f32.mrf.mxu0  ;;  %v253_v21 = vpop.f32.mrf.mxu1 }
  0xd4   :  { %344 = vst [vmem:[#allocation7 + $0x50] sm:$0xff] %v140_v20 }
  0xd5   :  { %345 = vst [vmem:[#allocation7 + $0x58] sm:$0xff] %v253_v21 }
  0xd7   :  { %v188_v22 = vpop.f32.mrf.mxu2  ;;  %v301_v23 = vpop.f32.mrf.mxu3 }
  0xd8   :  { %376 = vst [vmem:[#allocation7 + $0x150] sm:$0xff] %v188_v22 }
  0xd9   :  { %377 = vst [vmem:[#allocation7 + $0x158] sm:$0xff] %v301_v23 }
  0xdb   :  { %v143_v24 = vpop.f32.mrf.mxu0  ;;  %v256_v25 = vpop.f32.mrf.mxu1 }
  0xdc   :  { %346 = vst [vmem:[#allocation7 + $0x60] sm:$0xff] %v143_v24 }
  0xdd   :  { %347 = vst [vmem:[#allocation7 + $0x68] sm:$0xff] %v256_v25 }
  0xdf   :  { %v191_v26 = vpop.f32.mrf.mxu2  ;;  %v304_v27 = vpop.f32.mrf.mxu3 }
  0xe0   :  { %378 = vst [vmem:[#allocation7 + $0x160] sm:$0xff] %v191_v26 }
  0xe1   :  { %379 = vst [vmem:[#allocation7 + $0x168] sm:$0xff] %v304_v27 }
  0xe3   :  { %v146_v28 = vpop.f32.mrf.mxu0  ;;  %v259_v29 = vpop.f32.mrf.mxu1 }
  0xe4   :  { %348 = vst [vmem:[#allocation7 + $0x70] sm:$0xff] %v146_v28 }
  0xe5   :  { %349 = vst [vmem:[#allocation7 + $0x78] sm:$0xff] %v259_v29 }
  0xe7   :  { %v194_v30 = vpop.f32.mrf.mxu2  ;;  %v307_v31 = vpop.f32.mrf.mxu3 }
  0xe8   :  { %380 = vst [vmem:[#allocation7 + $0x170] sm:$0xff] %v194_v30 }
  0xe9   :  { %381 = vst [vmem:[#allocation7 + $0x178] sm:$0xff] %v307_v31 }
  0xeb   :  { %v149_v32 = vpop.f32.mrf.mxu0  ;;  %v262_v33 = vpop.f32.mrf.mxu1 }
  0xec   :  { %350 = vst [vmem:[#allocation7 + $0x80] sm:$0xff] %v149_v32 }
  0xed   :  { %351 = vst [vmem:[#allocation7 + $0x88] sm:$0xff] %v262_v33 }
  0xef   :  { %v197_v34 = vpop.f32.mrf.mxu2  ;;  %v310_v35 = vpop.f32.mrf.mxu3 }
  0xf0   :  { %382 = vst [vmem:[#allocation7 + $0x180] sm:$0xff] %v197_v34 }
  0xf1   :  { %383 = vst [vmem:[#allocation7 + $0x188] sm:$0xff] %v310_v35 }
  0xf3   :  { %v152_v36 = vpop.f32.mrf.mxu0  ;;  %v265_v37 = vpop.f32.mrf.mxu1 }
  0xf4   :  { %352 = vst [vmem:[#allocation7 + $0x90] sm:$0xff] %v152_v36 }
  0xf5   :  { %353 = vst [vmem:[#allocation7 + $0x98] sm:$0xff] %v265_v37 }
  0xf7   :  { %v200_v38 = vpop.f32.mrf.mxu2  ;;  %v313_v39 = vpop.f32.mrf.mxu3 }
  0xf8   :  { %384 = vst [vmem:[#allocation7 + $0x190] sm:$0xff] %v200_v38 }
  0xf9   :  { %385 = vst [vmem:[#allocation7 + $0x198] sm:$0xff] %v313_v39 }
  0xfb   :  { %v155_v40 = vpop.f32.mrf.mxu0  ;;  %v268_v41 = vpop.f32.mrf.mxu1 }
  0xfc   :  { %354 = vst [vmem:[#allocation7 + $0xa0] sm:$0xff] %v155_v40 }
  0xfd   :  { %355 = vst [vmem:[#allocation7 + $0xa8] sm:$0xff] %v268_v41 }
  0xff   :  { %v203_v42 = vpop.f32.mrf.mxu2  ;;  %v316_v43 = vpop.f32.mrf.mxu3 }
 0x100   :  { %386 = vst [vmem:[#allocation7 + $0x1a0] sm:$0xff] %v203_v42 }
 0x101   :  { %387 = vst [vmem:[#allocation7 + $0x1a8] sm:$0xff] %v316_v43 }
 0x103   :  { %v158_v44 = vpop.f32.mrf.mxu0  ;;  %v271_v45 = vpop.f32.mrf.mxu1 }
 0x104   :  { %356 = vst [vmem:[#allocation7 + $0xb0] sm:$0xff] %v158_v44 }
 0x105   :  { %357 = vst [vmem:[#allocation7 + $0xb8] sm:$0xff] %v271_v45 }
 0x107   :  { %v206_v46 = vpop.f32.mrf.mxu2  ;;  %v319_v47 = vpop.f32.mrf.mxu3 }
 0x108   :  { %388 = vst [vmem:[#allocation7 + $0x1b0] sm:$0xff] %v206_v46 }
 0x109   :  { %389 = vst [vmem:[#allocation7 + $0x1b8] sm:$0xff] %v319_v47 }
 0x10b   :  { %v161_v48 = vpop.f32.mrf.mxu0  ;;  %v274_v49 = vpop.f32.mrf.mxu1 }
 0x10c   :  { %358 = vst [vmem:[#allocation7 + $0xc0] sm:$0xff] %v161_v48 }
 0x10d   :  { %359 = vst [vmem:[#allocation7 + $0xc8] sm:$0xff] %v274_v49 }
 0x10f   :  { %v209_v50 = vpop.f32.mrf.mxu2  ;;  %v322_v51 = vpop.f32.mrf.mxu3 }
 0x110   :  { %390 = vst [vmem:[#allocation7 + $0x1c0] sm:$0xff] %v209_v50 }
 0x111   :  { %391 = vst [vmem:[#allocation7 + $0x1c8] sm:$0xff] %v322_v51 }
 0x113   :  { %v164_v52 = vpop.f32.mrf.mxu0  ;;  %v277_v53 = vpop.f32.mrf.mxu1 }
 0x114   :  { %360 = vst [vmem:[#allocation7 + $0xd0] sm:$0xff] %v164_v52 }
 0x115   :  { %361 = vst [vmem:[#allocation7 + $0xd8] sm:$0xff] %v277_v53 }
 0x117   :  { %v212_v54 = vpop.f32.mrf.mxu2  ;;  %v325_v55 = vpop.f32.mrf.mxu3 }
 0x118   :  { %392 = vst [vmem:[#allocation7 + $0x1d0] sm:$0xff] %v212_v54 }
 0x119   :  { %393 = vst [vmem:[#allocation7 + $0x1d8] sm:$0xff] %v325_v55 }
 0x11b   :  { %v167_v56 = vpop.f32.mrf.mxu0  ;;  %v280_v57 = vpop.f32.mrf.mxu1 }
 0x11c   :  { %362 = vst [vmem:[#allocation7 + $0xe0] sm:$0xff] %v167_v56 }
 0x11d   :  { %363 = vst [vmem:[#allocation7 + $0xe8] sm:$0xff] %v280_v57 }
 0x11f   :  { %v215_v58 = vpop.f32.mrf.mxu2  ;;  %v328_v59 = vpop.f32.mrf.mxu3 }
 0x120   :  { %394 = vst [vmem:[#allocation7 + $0x1e0] sm:$0xff] %v215_v58 }
 0x121   :  { %395 = vst [vmem:[#allocation7 + $0x1e8] sm:$0xff] %v328_v59 }
 0x123   :  { %v170_v60 = vpop.f32.mrf.mxu0  ;;  %v283_v61 = vpop.f32.mrf.mxu1 }
 0x124   :  { %364 = vst [vmem:[#allocation7 + $0xf0] sm:$0xff] %v170_v60 }
 0x125   :  { %365 = vst [vmem:[#allocation7 + $0xf8] sm:$0xff] %v283_v61 }
 0x127   :  { %v218_v62 = vpop.f32.mrf.mxu2  ;;  %v331_v63 = vpop.f32.mrf.mxu3 }
 0x128   :  { %396 = vst [vmem:[#allocation7 + $0x1f0] sm:$0xff] %v218_v62 }
 0x129   :  { %397 = vst [vmem:[#allocation7 + $0x1f8] sm:$0xff] %v331_v63 }
 0x12a   :  { %410 = dma.vmem_to_hbm [thread:$0]  %s403_s1, 8192, %s405_s25, [#allocation4], %s539_s21, %s539_s21, %s540_s22  }
 0x12b   :  { %533 = dma.done.wait [#allocation4], 8192  }
 0x12c   :  { %534 = vsyncadd [#allocation4], 4294959104 }
 0x12d   :  { %415 = vsyncpa [#allocation3], 1 }
 0x12e   :  { %416 = vsyncpa [#allocation6], 1 }
 0x12f   :  { %417 = vsyncpa [#allocation4], 1 }

</bundles_post_ra>
